<compile_context>
chip_gen: v5e
topology: v5e:2x2
jax: 0.10.0
libtpu: 0.0.40
codegen_flags: <defaults>
</compile_context>

<pallas_src>
import jax
import jax.numpy as jnp
from jax.experimental import pallas as pl
from jax.experimental.pallas import tpu as pltpu


def _round_up(n, m):
    return (n + m - 1) // m * m


def _cdiv(a, b):
    return (a + b - 1) // b


# --------------------------------------------------------------------------- #
# Kernel
# --------------------------------------------------------------------------- #
def _make_vae_kernel(half, packed_head):
    """half: lane offset of logvar inside the head slab; packed_head: 2*L <= 128."""

    def kernel(x_ref, eps_ref,
               w1_ref, b1_ref,
               wh_ref, bh_ref,
               w3_ref, b3_ref,
               w4_ref, b4_ref,
               recon_ref, head_ref):
        # ---- encoder: h = relu(x @ W1 + b1)  (bf16 MXU matmul, f32 accum/elementwise)
        h = jnp.dot(x_ref[...], w1_ref[...],
                    preferred_element_type=jnp.float32) + b1_ref[...]
        h = jnp.maximum(h, 0.0)

        # ---- fused mu|logvar head: one lane-dense matmul; bf16 writeback
        head = jnp.dot(h.astype(jnp.bfloat16), wh_ref[...],
                       preferred_element_type=jnp.float32) + bh_ref[...]
        head_ref[...] = head.astype(jnp.bfloat16)

        eps = eps_ref[...].astype(jnp.float32)
        if packed_head:
            # mu sits in lanes [0, half), logvar in [half, 2*half) of a 128-lane slab.
            # exp over every lane (EUP is cheap), then rotate the logvar-derived std
            # onto the mu lanes with one XLU roll -- no sub-128-lane slicing anywhere.
            std = pltpu.roll(jnp.exp(0.5 * head), half, 1)
            # Lanes >= L have eps == 0 and the matching W3 rows are zero, so the
            # "logvar garbage" lanes of z are inert in the decoder matmul.
            z = head + eps * std
        else:
            mu = head[:, :half]            # half is a multiple of 128: lane-dense slice
            logvar = head[:, half:]
            z = mu + eps * jnp.exp(0.5 * logvar)

        # ---- decoder: relu(z @ W3 + b3) -> sigmoid(h2 @ W4 + b4)
        h2 = jnp.dot(z.astype(jnp.bfloat16), w3_ref[...],
                     preferred_element_type=jnp.float32) + b3_ref[...]
        h2 = jnp.maximum(h2, 0.0)
        logits = jnp.dot(h2.astype(jnp.bfloat16), w4_ref[...],
                         preferred_element_type=jnp.float32) + b4_ref[...]
        # sigmoid via EUP exp + EUP approx reciprocal (keeps the VALU free); bf16 store
        recon_ref[...] = pl.reciprocal(1.0 + jnp.exp(-logits),
                                       approx=True).astype(jnp.bfloat16)

    return kernel


# --------------------------------------------------------------------------- #
# Host-side parameter packing
# --------------------------------------------------------------------------- #
def pack_params(p):
    """Pad feature dims to multiples of 128, fuse+pack the mu|logvar head, cast to bf16.

    Logical params use the (in_features, out_features) layout (x @ W + b).
    Call once on the host; the packed dict is what vae_forward consumes.
    """
    D, H = p["w1"].shape
    L = p["wmu"].shape[1]
    DP = _round_up(D, 128)
    packed_head = (2 * L) <= 128
    HALF = 64 if packed_head else _round_up(L, 128)   # lane offset of logvar in the head
    HEAD_W = 2 * HALF                                  # head slab width (>= 128)
    ZP = 128 if packed_head else HALF                  # z / decoder-input width

    def padw(w, rows, cols):
        out = jnp.zeros((rows, cols), jnp.bfloat16)
        return out.at[: w.shape[0], : w.shape[1]].set(w.astype(jnp.bfloat16))

    def padb(b, cols):
        out = jnp.zeros((1, cols), jnp.float32)
        return out.at[:, : b.shape[1]].set(b.astype(jnp.float32))

    whead = jnp.zeros((H, HEAD_W), jnp.bfloat16)
    whead = whead.at[:, :L].set(p["wmu"].astype(jnp.bfloat16))
    whead = whead.at[:, HALF:HALF + L].set(p["wlv"].astype(jnp.bfloat16))
    bhead = jnp.zeros((1, HEAD_W), jnp.float32)
    bhead = bhead.at[:, :L].set(p["bmu"].astype(jnp.float32))
    bhead = bhead.at[:, HALF:HALF + L].set(p["blv"].astype(jnp.float32))

    return dict(
        w1=padw(p["w1"], DP, H), b1=padb(p["b1"], H),
        whead=whead, bhead=bhead,
        w3=padw(p["w3"], ZP, H), b3=padb(p["b3"], H),
        w4=padw(p["w4"], H, DP), b4=padb(p["b4"], DP),
    )


# --------------------------------------------------------------------------- #
# Forward wrapper
# --------------------------------------------------------------------------- #
def vae_forward(x, eps, packed, *, block_b=1024):
    """Fused VAE forward.  x: (B, D), eps: (B, L), packed = pack_params(params).

    Returns (recon, mu, logvar) in bfloat16 (kernel writeback precision).
    """
    B, D = x.shape
    L = eps.shape[1]
    DP, H = packed["w1"].shape
    HEAD_W = packed["whead"].shape[1]
    ZP = packed["w3"].shape[0]
    HALF = HEAD_W // 2
    packed_head = HALF < ZP

    # --- tile / grid selection ------------------------------------------------
    # Minimize batch padding (TB ~= ceil(B / n_steps)) and give the batch axis >= 2
    # (even) steps when B allows, so both v7x TensorCores get work under "parallel".
    n_steps = _cdiv(B, block_b)
    if B >= 16:
        n_steps = max(n_steps, 2)
    if n_steps > 1 and n_steps % 2 == 1:
        n_steps += 1
    TB = _round_up(_cdiv(B, n_steps), 16)      # 16-row multiple: bf16 sublane tile
    BP = _round_up(B, TB)
    grid = (BP // TB,)

    # --- input staging: skip pads / casts when shapes & dtypes already match ---
    if B == BP and D == DP:
        xp = x if x.dtype == jnp.bfloat16 else x.astype(jnp.bfloat16)
    else:
        xp = jnp.zeros((BP, DP), jnp.bfloat16).at[:B, :D].set(x.astype(jnp.bfloat16))
    if B == BP and L == ZP:
        epsp = eps if eps.dtype == jnp.bfloat16 else eps.astype(jnp.bfloat16)
    else:
        epsp = jnp.zeros((BP, ZP), jnp.bfloat16).at[:B, :L].set(eps.astype(jnp.bfloat16))

    def row_spec(width):                       # per-batch-tile operands / results
        return pl.BlockSpec((TB, width), lambda i: (i, 0))

    def resident(shape):                       # weights / biases: stay in VMEM
        return pl.BlockSpec(shape, lambda i: (0, 0))

    weight_bytes = sum(int(packed[k].size) * packed[k].dtype.itemsize for k in
                       ("w1", "b1", "whead", "bhead", "w3", "b3", "w4", "b4"))
    tile_bytes = TB * 2 * (DP + ZP + DP + HEAD_W)        # bf16 x, eps, recon, head
    footprint = 2 * weight_bytes + 2 * tile_bytes        # double-buffered
    vmem_limit = int(min(56 << 20, max(32 << 20, 2 * footprint)))

    flops = 2 * BP * (DP * H + H * HEAD_W + ZP * H + H * DP)
    transcendentals = BP * (HEAD_W + 2 * DP)
    bytes_accessed = BP * 2 * (DP + ZP + DP + HEAD_W) + weight_bytes

    recon_p, head_p = pl.pallas_call(
        _make_vae_kernel(HALF, packed_head),
        out_shape=(
            jax.ShapeDtypeStruct((BP, DP), jnp.bfloat16),      # recon (padded)
            jax.ShapeDtypeStruct((BP, HEAD_W), jnp.bfloat16),  # mu | logvar slab
        ),
        grid=grid,
        in_specs=[
            row_spec(DP),                                   # x tile
            row_spec(ZP),                                   # eps tile
            resident((DP, H)), resident((1, H)),            # w1, b1
            resident((H, HEAD_W)), resident((1, HEAD_W)),   # whead, bhead
            resident((ZP, H)), resident((1, H)),            # w3, b3
            resident((H, DP)), resident((1, DP)),           # w4, b4
        ],
        out_specs=(row_spec(DP), row_spec(HEAD_W)),
        compiler_params=pltpu.CompilerParams(
            dimension_semantics=("parallel",),              # shard batch on v7x's 2 TCs
            vmem_limit_bytes=vmem_limit,
        ),
        cost_estimate=pl.CostEstimate(
            flops=int(flops),
            transcendentals=int(transcendentals),
            bytes_accessed=int(bytes_accessed)),
    )(xp, epsp,
      packed["w1"], packed["b1"],
      packed["whead"], packed["bhead"],
      packed["w3"], packed["b3"],
      packed["w4"], packed["b4"])

    # Logical-shape outputs (tiny slices; a padded-output variant could skip these).
    recon = recon_p[:B, :D]
    mu = head_p[:B, :L]
    logvar = head_p[:B, HALF:HALF + L]
    return recon, mu, logvar


# --------------------------------------------------------------------------- #
# Params + references
# --------------------------------------------------------------------------- #
def init_params(key, input_dim, latent_dim, hidden=128):
    """Deterministic parameter init (Linear weights stored transposed: (in, out))."""
    ks = jax.random.split(key, 5)

    def linear(k, fan_in, fan_out):
        bound = 1.0 / jnp.sqrt(fan_in)
        kw, kb = jax.random.split(k)
        w = jax.random.uniform(kw, (fan_in, fan_out), jnp.float32, -bound, bound)
        b = jax.random.uniform(kb, (1, fan_out), jnp.float32, -bound, bound)
        return w, b

    w1, b1 = linear(ks[0], input_dim, hidden)
    wmu, bmu = linear(ks[1], hidden, latent_dim)
    wlv, blv = linear(ks[2], hidden, latent_dim)
    w3, b3 = linear(ks[3], latent_dim, hidden)
    w4, b4 = linear(ks[4], hidden, input_dim)
    return dict(w1=w1, b1=b1, wmu=wmu, bmu=bmu, wlv=wlv, blv=blv,
                w3=w3, b3=b3, w4=w4, b4=b4)


def vae_forward_ref_f32(x, eps, p):
    """Pure-JAX f32 reference matching PyTorch semantics exactly."""
    h = jax.nn.relu(x @ p["w1"] + p["b1"])
    mu = h @ p["wmu"] + p["bmu"]
    logvar = h @ p["wlv"] + p["blv"]
    z = mu + eps * jnp.exp(0.5 * logvar)
    h2 = jax.nn.relu(z @ p["w3"] + p["b3"])
    recon = jax.nn.sigmoid(h2 @ p["w4"] + p["b4"])
    return recon, mu, logvar


def vae_forward_ref_mixed(x, eps, p):
    """Pure-JAX reference mimicking the kernel's bf16-matmul / bf16-eps / f32-elementwise scheme."""
    def mm(a, w):
        return jnp.dot(a.astype(jnp.bfloat16), w.astype(jnp.bfloat16),
                       preferred_element_type=jnp.float32)
    h = jnp.maximum(mm(x, p["w1"]) + p["b1"], 0.0)
    mu = mm(h, p["wmu"]) + p["bmu"]
    logvar = mm(h, p["wlv"]) + p["blv"]
    e = eps.astype(jnp.bfloat16).astype(jnp.float32)
    z = mu + e * jnp.exp(0.5 * logvar)
    h2 = jnp.maximum(mm(z, p["w3"]) + p["b3"], 0.0)
    recon = jax.nn.sigmoid(mm(h2, p["w4"]) + p["b4"])
    return recon, mu, logvar


if __name__ == "__main__":
    B, INPUT_DIM, LATENT_DIM = 8, 64, 16

    key = jax.random.PRNGKey(0)
    k_x, k_eps, k_p = jax.random.split(key, 3)

    x = jax.random.normal(k_x, (B, INPUT_DIM), jnp.float32)
    eps = jax.random.normal(k_eps, (B, LATENT_DIM), jnp.float32)   # randn_like(std)
    params = init_params(k_p, INPUT_DIM, LATENT_DIM)
    packed = pack_params(params)

    fwd = jax.jit(vae_forward)
    recon, mu, logvar = jax.block_until_ready(fwd(x, eps, packed))

    recon32 = recon.astype(jnp.float32)
    mu32 = mu.astype(jnp.float32)
    logvar32 = logvar.astype(jnp.float32)

    # Tight check vs a reference with identical mixed precision; tolerance covers the
    # bf16 output rounding + the EUP approx-reciprocal sigmoid.
    r_m, mu_m, lv_m = vae_forward_ref_mixed(x, eps, params)
    assert bool(jnp.allclose(mu32, mu_m, atol=2e-2)), "mu mismatch (mixed ref)"
    assert bool(jnp.allclose(logvar32, lv_m, atol=2e-2)), "logvar mismatch (mixed ref)"
    assert bool(jnp.allclose(recon32, r_m, atol=2e-2)), "recon mismatch (mixed ref)"

    # Loose sanity check vs the full-f32 PyTorch-semantics reference (bf16 matmul error).
    r_f, mu_f, lv_f = vae_forward_ref_f32(x, eps, params)
    assert bool(jnp.allclose(mu32, mu_f, atol=1.5e-1)), "mu mismatch (f32 ref)"
    assert bool(jnp.allclose(logvar32, lv_f, atol=1.5e-1)), "logvar mismatch (f32 ref)"
    assert bool(jnp.allclose(recon32, r_f, atol=1.5e-1)), "recon mismatch (f32 ref)"

    print("KERNEL_OK")
</pallas_src>

<mosaic_0001>
module attributes {stable_mosaic.version = 11 : i64} {
  func.func @kernel(%arg0: i32, %arg1: memref<16x128xbf16, #tpu.memory_space<vmem>>, %arg2: memref<16x128xbf16, #tpu.memory_space<vmem>>, %arg3: memref<128x128xbf16, #tpu.memory_space<vmem>>, %arg4: memref<1x128xf32, #tpu.memory_space<vmem>>, %arg5: memref<128x128xbf16, #tpu.memory_space<vmem>>, %arg6: memref<1x128xf32, #tpu.memory_space<vmem>>, %arg7: memref<128x128xbf16, #tpu.memory_space<vmem>>, %arg8: memref<1x128xf32, #tpu.memory_space<vmem>>, %arg9: memref<128x128xbf16, #tpu.memory_space<vmem>>, %arg10: memref<1x128xf32, #tpu.memory_space<vmem>>, %arg11: memref<16x128xbf16, #tpu.memory_space<vmem>>, %arg12: memref<16x128xbf16, #tpu.memory_space<vmem>>) attributes {dimension_semantics = [#tpu.dimension_semantics<parallel>], iteration_bounds = array<i64: 1>, scalar_prefetch = 0 : i64, scratch_operands = 0 : i64, tpu.core_type = #tpu.core_type<tc>, window_params = [{transform_indices = @transform_0, window_bounds = array<i64: 16, 128>}, {transform_indices = @transform_1, window_bounds = array<i64: 16, 128>}, {pipeline_mode = #tpu.pipeline_mode<synchronous>, transform_indices = @transform_2, window_bounds = array<i64: 128, 128>}, {pipeline_mode = #tpu.pipeline_mode<synchronous>, transform_indices = @transform_3, window_bounds = array<i64: 1, 128>}, {pipeline_mode = #tpu.pipeline_mode<synchronous>, transform_indices = @transform_4, window_bounds = array<i64: 128, 128>}, {pipeline_mode = #tpu.pipeline_mode<synchronous>, transform_indices = @transform_5, window_bounds = array<i64: 1, 128>}, {pipeline_mode = #tpu.pipeline_mode<synchronous>, transform_indices = @transform_6, window_bounds = array<i64: 128, 128>}, {pipeline_mode = #tpu.pipeline_mode<synchronous>, transform_indices = @transform_7, window_bounds = array<i64: 1, 128>}, {pipeline_mode = #tpu.pipeline_mode<synchronous>, transform_indices = @transform_8, window_bounds = array<i64: 128, 128>}, {pipeline_mode = #tpu.pipeline_mode<synchronous>, transform_indices = @transform_9, window_bounds = array<i64: 1, 128>}, {transform_indices = @transform_10, window_bounds = array<i64: 16, 128>}, {transform_indices = @transform_11, window_bounds = array<i64: 16, 128>}]} {
    %c0 = arith.constant 0 : index
    %c0_0 = arith.constant 0 : index
    %0 = vector.load %arg1[%c0, %c0_0] : memref<16x128xbf16, #tpu.memory_space<vmem>>, vector<16x128xbf16>
    %c0_1 = arith.constant 0 : index
    %c0_2 = arith.constant 0 : index
    %1 = vector.load %arg3[%c0_1, %c0_2] : memref<128x128xbf16, #tpu.memory_space<vmem>>, vector<128x128xbf16>
    %cst = arith.constant dense<0.000000e+00> : vector<16x128xf32>
    %2 = tpu.matmul %0, %1, %cst {dimension_numbers = #tpu.dot_dimension_numbers<[1], [0], [0], [1], [0, 0, 1, 1], [], []>} : vector<16x128xbf16>, vector<128x128xbf16>, vector<16x128xf32> -> vector<16x128xf32>
    %c0_3 = arith.constant 0 : index
    %c0_4 = arith.constant 0 : index
    %3 = vector.load %arg4[%c0_3, %c0_4] : memref<1x128xf32, #tpu.memory_space<vmem>>, vector<1x128xf32>
    %4 = vector.broadcast %3 : vector<1x128xf32> to vector<16x128xf32>
    %5 = arith.addf %2, %4 : vector<16x128xf32>
    %cst_5 = arith.constant 0.000000e+00 : f32
    %6 = vector.broadcast %cst_5 : f32 to vector<16x128xf32>
    %7 = arith.maximumf %5, %6 : vector<16x128xf32>
    %8 = arith.truncf %7 : vector<16x128xf32> to vector<16x128xbf16>
    %c0_6 = arith.constant 0 : index
    %c0_7 = arith.constant 0 : index
    %9 = vector.load %arg5[%c0_6, %c0_7] : memref<128x128xbf16, #tpu.memory_space<vmem>>, vector<128x128xbf16>
    %cst_8 = arith.constant dense<0.000000e+00> : vector<16x128xf32>
    %10 = tpu.matmul %8, %9, %cst_8 {dimension_numbers = #tpu.dot_dimension_numbers<[1], [0], [0], [1], [0, 0, 1, 1], [], []>} : vector<16x128xbf16>, vector<128x128xbf16>, vector<16x128xf32> -> vector<16x128xf32>
    %c0_9 = arith.constant 0 : index
    %c0_10 = arith.constant 0 : index
    %11 = vector.load %arg6[%c0_9, %c0_10] : memref<1x128xf32, #tpu.memory_space<vmem>>, vector<1x128xf32>
    %12 = vector.broadcast %11 : vector<1x128xf32> to vector<16x128xf32>
    %13 = arith.addf %10, %12 : vector<16x128xf32>
    %14 = arith.truncf %13 : vector<16x128xf32> to vector<16x128xbf16>
    %c0_11 = arith.constant 0 : index
    %c0_12 = arith.constant 0 : index
    %15 = vector.load %arg12[%c0_11, %c0_12] : memref<16x128xbf16, #tpu.memory_space<vmem>>, vector<16x128xbf16>
    tpu.vector_store %arg12[%c0_11, %c0_12], %14 {strides = array<i32>} : memref<16x128xbf16, #tpu.memory_space<vmem>>, vector<16x128xbf16>,
    %c0_13 = arith.constant 0 : index
    %c0_14 = arith.constant 0 : index
    %16 = vector.load %arg2[%c0_13, %c0_14] : memref<16x128xbf16, #tpu.memory_space<vmem>>, vector<16x128xbf16>
    %17 = arith.extf %16 : vector<16x128xbf16> to vector<16x128xf32>
    %cst_15 = arith.constant 5.000000e-01 : f32
    %18 = vector.broadcast %cst_15 : f32 to vector<16x128xf32>
    %19 = arith.mulf %18, %13 : vector<16x128xf32>
    %20 = math.exp %19 : vector<16x128xf32>
    %c64_i32 = arith.constant 64 : i32
    %21 = tpu.dynamic_rotate %20 by %c64_i32 dim 1 : vector<16x128xf32>, i32 -> vector<16x128xf32>
    %22 = arith.mulf %17, %21 : vector<16x128xf32>
    %23 = arith.addf %13, %22 : vector<16x128xf32>
    %24 = arith.truncf %23 : vector<16x128xf32> to vector<16x128xbf16>
    %c0_16 = arith.constant 0 : index
    %c0_17 = arith.constant 0 : index
    %25 = vector.load %arg7[%c0_16, %c0_17] : memref<128x128xbf16, #tpu.memory_space<vmem>>, vector<128x128xbf16>
    %cst_18 = arith.constant dense<0.000000e+00> : vector<16x128xf32>
    %26 = tpu.matmul %24, %25, %cst_18 {dimension_numbers = #tpu.dot_dimension_numbers<[1], [0], [0], [1], [0, 0, 1, 1], [], []>} : vector<16x128xbf16>, vector<128x128xbf16>, vector<16x128xf32> -> vector<16x128xf32>
    %c0_19 = arith.constant 0 : index
    %c0_20 = arith.constant 0 : index
    %27 = vector.load %arg8[%c0_19, %c0_20] : memref<1x128xf32, #tpu.memory_space<vmem>>, vector<1x128xf32>
    %28 = vector.broadcast %27 : vector<1x128xf32> to vector<16x128xf32>
    %29 = arith.addf %26, %28 : vector<16x128xf32>
    %cst_21 = arith.constant 0.000000e+00 : f32
    %30 = vector.broadcast %cst_21 : f32 to vector<16x128xf32>
    %31 = arith.maximumf %29, %30 : vector<16x128xf32>
    %32 = arith.truncf %31 : vector<16x128xf32> to vector<16x128xbf16>
    %c0_22 = arith.constant 0 : index
    %c0_23 = arith.constant 0 : index
    %33 = vector.load %arg9[%c0_22, %c0_23] : memref<128x128xbf16, #tpu.memory_space<vmem>>, vector<128x128xbf16>
    %cst_24 = arith.constant dense<0.000000e+00> : vector<16x128xf32>
    %34 = tpu.matmul %32, %33, %cst_24 {dimension_numbers = #tpu.dot_dimension_numbers<[1], [0], [0], [1], [0, 0, 1, 1], [], []>} : vector<16x128xbf16>, vector<128x128xbf16>, vector<16x128xf32> -> vector<16x128xf32>
    %c0_25 = arith.constant 0 : index
    %c0_26 = arith.constant 0 : index
    %35 = vector.load %arg10[%c0_25, %c0_26] : memref<1x128xf32, #tpu.memory_space<vmem>>, vector<1x128xf32>
    %36 = vector.broadcast %35 : vector<1x128xf32> to vector<16x128xf32>
    %37 = arith.addf %34, %36 : vector<16x128xf32>
    %cst_27 = arith.constant 0.000000e+00 : f32
    %38 = vector.broadcast %cst_27 : f32 to vector<16x128xf32>
    %39 = arith.subf %38, %37 : vector<16x128xf32>
    %40 = math.exp %39 : vector<16x128xf32>
    %cst_28 = arith.constant 1.000000e+00 : f32
    %41 = vector.broadcast %cst_28 : f32 to vector<16x128xf32>
    %42 = arith.addf %41, %40 : vector<16x128xf32>
    %43 = tpu.reciprocal %42 {approx = true} : vector<16x128xf32> -> vector<16x128xf32>
    %44 = arith.truncf %43 : vector<16x128xf32> to vector<16x128xbf16>
    %c0_29 = arith.constant 0 : index
    %c0_30 = arith.constant 0 : index
    %45 = vector.load %arg11[%c0_29, %c0_30] : memref<16x128xbf16, #tpu.memory_space<vmem>>, vector<16x128xbf16>
    tpu.vector_store %arg11[%c0_29, %c0_30], %44 {strides = array<i32>} : memref<16x128xbf16, #tpu.memory_space<vmem>>, vector<16x128xbf16>,
    return
  }
  func.func @transform_0(%arg0: i32) -> (i32, i32) {
    %c0_i32 = arith.constant 0 : i32
    %c0_i32_0 = arith.constant 0 : i32
    return %arg0, %c0_i32 : i32, i32
  }
  func.func @transform_1(%arg0: i32) -> (i32, i32) {
    %c0_i32 = arith.constant 0 : i32
    %c0_i32_0 = arith.constant 0 : i32
    return %arg0, %c0_i32 : i32, i32
  }
  func.func @transform_2(%arg0: i32) -> (i32, i32) {
    %c0_i32 = arith.constant 0 : i32
    %c0_i32_0 = arith.constant 0 : i32
    %c0_i32_1 = arith.constant 0 : i32
    return %c0_i32, %c0_i32_0 : i32, i32
  }
  func.func @transform_3(%arg0: i32) -> (i32, i32) {
    %c0_i32 = arith.constant 0 : i32
    %c0_i32_0 = arith.constant 0 : i32
    %c0_i32_1 = arith.constant 0 : i32
    return %c0_i32, %c0_i32_0 : i32, i32
  }
  func.func @transform_4(%arg0: i32) -> (i32, i32) {
    %c0_i32 = arith.constant 0 : i32
    %c0_i32_0 = arith.constant 0 : i32
    %c0_i32_1 = arith.constant 0 : i32
    return %c0_i32, %c0_i32_0 : i32, i32
  }
  func.func @transform_5(%arg0: i32) -> (i32, i32) {
    %c0_i32 = arith.constant 0 : i32
    %c0_i32_0 = arith.constant 0 : i32
    %c0_i32_1 = arith.constant 0 : i32
    return %c0_i32, %c0_i32_0 : i32, i32
  }
  func.func @transform_6(%arg0: i32) -> (i32, i32) {
    %c0_i32 = arith.constant 0 : i32
    %c0_i32_0 = arith.constant 0 : i32
    %c0_i32_1 = arith.constant 0 : i32
    return %c0_i32, %c0_i32_0 : i32, i32
  }
  func.func @transform_7(%arg0: i32) -> (i32, i32) {
    %c0_i32 = arith.constant 0 : i32
    %c0_i32_0 = arith.constant 0 : i32
    %c0_i32_1 = arith.constant 0 : i32
    return %c0_i32, %c0_i32_0 : i32, i32
  }
  func.func @transform_8(%arg0: i32) -> (i32, i32) {
    %c0_i32 = arith.constant 0 : i32
    %c0_i32_0 = arith.constant 0 : i32
    %c0_i32_1 = arith.constant 0 : i32
    return %c0_i32, %c0_i32_0 : i32, i32
  }
  func.func @transform_9(%arg0: i32) -> (i32, i32) {
    %c0_i32 = arith.constant 0 : i32
    %c0_i32_0 = arith.constant 0 : i32
    %c0_i32_1 = arith.constant 0 : i32
    return %c0_i32, %c0_i32_0 : i32, i32
  }
  func.func @transform_10(%arg0: i32) -> (i32, i32) {
    %c0_i32 = arith.constant 0 : i32
    %c0_i32_0 = arith.constant 0 : i32
    return %arg0, %c0_i32 : i32, i32
  }
  func.func @transform_11(%arg0: i32) -> (i32, i32) {
    %c0_i32 = arith.constant 0 : i32
    %c0_i32_0 = arith.constant 0 : i32
    return %arg0, %c0_i32 : i32, i32
  }
}

</mosaic_0001>

<bundles_post_ra>
// kernel: vae_forward.1
= control target key start
LH: loop header
LB: loop body
LE: loop exit
PB: predicated region body
PF: predicated region fallthrough
CT: control target
= control target key end

     0   :  { %17 = vsyncpa [#allocation3], 0  ;;  %s905_s0 = inlined_call_operand.vmem [shape: bf16[16,128], index: 0, kind: input, shape index: {}]   ;;  %s906_s1 = inlined_call_operand.vmem [shape: bf16[16,128], index: 1, kind: input, shape index: {}]   ;;  %s907_s2 = inlined_call_operand.hbm [shape: bf16[128,128], index: 2, kind: input, shape index: {}]   ;;  %s908_s3 = inlined_call_operand.vmem [shape: f32[1,128], index: 3, kind: input, shape index: {}]   ;;  %s909_s4 = inlined_call_operand.hbm [shape: bf16[128,128], index: 4, kind: input, shape index: {}]   ;;  %s910_s5 = inlined_call_operand.vmem [shape: f32[1,128], index: 5, kind: input, shape index: {}]   ;;  %s911_s6 = inlined_call_operand.hbm [shape: bf16[128,128], index: 6, kind: input, shape index: {}]   ;;  %s912_s7 = inlined_call_operand.vmem [shape: f32[1,128], index: 7, kind: input, shape index: {}]   ;;  %s913_s8 = inlined_call_operand.hbm [shape: bf16[128,128], index: 8, kind: input, shape index: {}]   ;;  %s914_s9 = inlined_call_operand.vmem [shape: f32[1,128], index: 9, kind: input, shape index: {}]   ;;  %s915_s10 = inlined_call_operand.vmem [shape: bf16[16,128], index: 10, kind: output, shape index: {0}]   ;;  %s916_s11 = inlined_call_operand.vmem [shape: bf16[16,128], index: 11, kind: output, shape index: {1}]  }
   0x1   :  { %18 = vsyncpa [#allocation5], 0 }
   0x2   :  { %19 = vsyncpa [#allocation8], 0  ;;  %s43_s19 = sshll.u32 %s909_s4, 4  ;;  %s793_s20 = smov [#allocation4]   ;;  %s44_s19 = int_to_ptr.hbm [resolvable:$true] %s43_s19 }
   0x3   :  { %s45_s21 = sshll.u32 %s793_s20, 4  ;;  %s28_s24 = sshll.u32 %s907_s2, 4  ;;  %s46_s21 = int_to_ptr.vmem [resolvable:$true] %s45_s21  ;;  %s29_s24 = int_to_ptr.hbm [resolvable:$true] %s28_s24 }
   0x4   :  { %s794_s25 = smov 64   ;;  %s795_s26 = smov 4  }
   0x5   :  { %51 = dma.hbm_to_vmem [thread:$0]  %s44_s19, 1024, %s46_s21, [#allocation5], %s794_s25, %s794_s25, %s795_s26  }
   0x6   :  { %s796_s27 = smov [#allocation2]   ;;  %s58_s4 = sshll.u32 %s911_s6, 4  ;;  %s59_s4 = int_to_ptr.hbm [resolvable:$true] %s58_s4 }
   0x7   :  { %s30_s28 = sshll.u32 %s796_s27, 4  ;;  %s73_s2 = sshll.u32 %s913_s8, 4  ;;  %s31_s28 = int_to_ptr.vmem [resolvable:$true] %s30_s28  ;;  %s74_s2 = int_to_ptr.hbm [resolvable:$true] %s73_s2 }
   0x8   :  { %36 = dma.hbm_to_vmem [thread:$0]  %s29_s24, 1024, %s31_s28, [#allocation3], %s794_s25, %s794_s25, %s795_s26  }
   0x9   :  { %s797_s14 = smov [#allocation6]   ;;  %s798_s16 = smov [#allocation7]  }
   0xa   :  { %s60_s15 = sshll.u32 %s797_s14, 4  ;;  %s75_s17 = sshll.u32 %s798_s16, 4  ;;  %s61_s15 = int_to_ptr.vmem [resolvable:$true] %s60_s15  ;;  %s76_s17 = int_to_ptr.vmem [resolvable:$true] %s75_s17 }
   0xb   :  { %66 = dma.hbm_to_vmem [thread:$0]  %s59_s4, 1024, %s61_s15, [#allocation5], %s794_s25, %s794_s25, %s795_s26  }
   0xc   :  { %81 = dma.hbm_to_vmem [thread:$0]  %s74_s2, 1024, %s76_s17, [#allocation8], %s794_s25, %s794_s25, %s795_s26  }
   0xd   :  { %787 = dma.done.wait [#allocation3], 1024  }
   0xe   :  { %788 = vsyncadd [#allocation3], 4294966272 }
   0xf   :  { %789 = dma.done.wait [#allocation5], 2048  }
  0x10   :  { %790 = vsyncadd [#allocation5], 4294965248 }
  0x11   :  { %791 = dma.done.wait [#allocation8], 1024  }
  0x12   :  { %792 = vsyncadd [#allocation8], 4294966272  ;;  %v630_v0 = vld [vmem:[#allocation2 + $0x38] sm:$0xff]  ;;  %v629_v1 = vld [vmem:[#allocation2 + $0x30] sm:$0xff] }
  0x13   :  { %176 = vmatpush.bf16.msra.mxu0 %v630_v0  ;;  %v638_v2 = vld [vmem:[#allocation4 + $0x38] sm:$0xff]  ;;  %v637_v3 = vld [vmem:[#allocation4 + $0x30] sm:$0xff]  ;;  %v628_v4 = vld [vmem:[#allocation2 + $0x28] sm:$0xff] }
  0x14   :  { %261 = vmatpush.bf16.msra.mxu1 %v638_v2  ;;  %v636_v5 = vld [vmem:[#allocation4 + $0x28] sm:$0xff]  ;;  %v627_v6 = vld [vmem:[#allocation2 + $0x20] sm:$0xff]  ;;  %v626_v8 = vld [vmem:[#allocation2 + $0x18] sm:$0xff] }
  0x15   :  { %v635_v7 = vld [vmem:[#allocation4 + $0x20] sm:$0xff]  ;;  %v625_v9 = vld [vmem:[#allocation2 + $0x10] sm:$0xff]  ;;  %v624_v10 = vld [vmem:[#allocation2 + $0x8] sm:$0xff] }
  0x16   :  { %v623_v11 = vld [vmem:[#allocation2] sm:$0xff]  ;;  %v634_v13 = vld [vmem:[#allocation4 + $0x18] sm:$0xff]  ;;  %v633_v14 = vld [vmem:[#allocation4 + $0x10] sm:$0xff] }
  0x17   :  { %177 = vmatpush.bf16.msra.mxu0 %v629_v1  ;;  %v622_v12 = vld [vmem:[%s905_s0] sm:$0xff]  ;;  %v632_v15 = vld [vmem:[#allocation4 + $0x8] sm:$0xff]  ;;  %v646_v25 = vld [vmem:[#allocation6 + $0x38] sm:$0xff] }
  0x18   :  { %262 = vmatpush.bf16.msra.mxu1 %v637_v3  ;;  %v631_v16 = vld [vmem:[#allocation4] sm:$0xff]  ;;  %366 = vmatpush.bf16.msra.mxu2 %v646_v25  ;;  %v645_v26 = vld [vmem:[#allocation6 + $0x30] sm:$0xff]  ;;  %v644_v27 = vld [vmem:[#allocation6 + $0x28] sm:$0xff] }
  0x19   :  { %v675_v18 = vld [vmem:[%s908_s3] ss:$0 sm:$0xff]  ;;  %v642_v33 = vld [vmem:[#allocation6 + $0x18] sm:$0xff]  ;;  %v641_v42 = vld [vmem:[#allocation6 + $0x10] sm:$0xff] }
  0x1a   :  { %v676_v28 = vld [vmem:[%s910_s5] ss:$0 sm:$0xff]  ;;  %v640_v43 = vld [vmem:[#allocation6 + $0x8] sm:$0xff]  ;;  %v654_v45 = vld [vmem:[#allocation7 + $0x38] sm:$0xff] }
  0x1b   :  { %178 = vmatpush.bf16.msra.mxu0 %v628_v4  ;;  %v643_v30 = vld [vmem:[#allocation6 + $0x20] sm:$0xff]  ;;  %451 = vmatpush.bf16.msra.mxu3 %v654_v45  ;;  %v653_v46 = vld [vmem:[#allocation7 + $0x30] sm:$0xff]  ;;  %v652_v47 = vld [vmem:[#allocation7 + $0x28] sm:$0xff] }
  0x1c   :  { %263 = vmatpush.bf16.msra.mxu1 %v636_v5  ;;  %367 = vmatpush.bf16.msra.mxu2 %v645_v26  ;;  %v639_v44 = vld [vmem:[#allocation6] sm:$0xff]  ;;  %v650_v59 = vld [vmem:[#allocation7 + $0x18] sm:$0xff]  ;;  %v649_v60 = vld [vmem:[#allocation7 + $0x10] sm:$0xff] }
  0x1d   :  { %v651_v48 = vld [vmem:[#allocation7 + $0x20] sm:$0xff]  ;;  %v648_v61 = vld [vmem:[#allocation7 + $0x8] sm:$0xff] }
  0x1e   :  { %v661_v49 = vld [vmem:[%s906_s1] sm:$0xff]  }
  0x1f   :  { %179 = vmatpush.bf16.msra.mxu0 %v627_v6  ;;  %452 = vmatpush.bf16.msra.mxu3 %v653_v46  ;;  %v662_v51 = vunpack.c.l.bf16 %v661_v49  ;;  %v663_v52 = vunpack.c.h.bf16 %v661_v49  ;;  %v647_v62 = vld [vmem:[#allocation7] sm:$0xff] }
  0x20   :  { %264 = vmatpush.bf16.msra.mxu1 %v635_v7  ;;  %368 = vmatpush.bf16.msra.mxu2 %v644_v27  ;;  %v677_v0 = vld [vmem:[%s912_s7] ss:$0 sm:$0xff] }
  0x21   :  { %v678_v7 = vld [vmem:[%s914_s9] ss:$0 sm:$0xff] }
  0x23   :  { %180 = vmatpush.bf16.msra.mxu0 %v626_v8  ;;  %453 = vmatpush.bf16.msra.mxu3 %v652_v47 }
  0x24   :  { %265 = vmatpush.bf16.msra.mxu1 %v634_v13  ;;  %369 = vmatpush.bf16.msra.mxu2 %v643_v30 }
  0x27   :  { %181 = vmatpush.bf16.msra.mxu0 %v625_v9  ;;  %454 = vmatpush.bf16.msra.mxu3 %v651_v48 }
  0x28   :  { %266 = vmatpush.bf16.msra.mxu1 %v633_v14  ;;  %370 = vmatpush.bf16.msra.mxu2 %v642_v33 }
  0x2b   :  { %182 = vmatpush.bf16.msra.mxu0 %v624_v10  ;;  %455 = vmatpush.bf16.msra.mxu3 %v650_v59 }
  0x2c   :  { %267 = vmatpush.bf16.msra.mxu1 %v632_v15  ;;  %371 = vmatpush.bf16.msra.mxu2 %v641_v42 }
  0x2f   :  { %183 = vmatpush.bf16.msra.mxu0 %v623_v11  ;;  %456 = vmatpush.bf16.msra.mxu3 %v649_v60 }
  0x30   :  { %268 = vmatpush.bf16.msra.mxu1 %v631_v16  ;;  %372 = vmatpush.bf16.msra.mxu2 %v640_v43 }
  0x32   :  { %184 = vmatmul.bf16.vlgmr.msra.gmra.mxu0 %v622_v12 }
  0x33   :  { %457 = vmatpush.bf16.msra.mxu3 %v648_v61 }
  0x34   :  { %373 = vmatpush.bf16.msra.mxu2 %v639_v44 }
  0x37   :  { %458 = vmatpush.bf16.msra.mxu3 %v647_v62 }
  0xaf   :  { %v185_v17 = vpop.f32.mrf.mxu0 }
  0xb0   :  { %v186_v19 = vadd.f32 %v675_v18, %v185_v17 }
  0xb2   :  { %v190_v22 = vmax.f32 %v186_v19, 0.0 }
  0xb7   :  { %v187_v20 = vpop.f32.mrf.mxu0 }
  0xb8   :  { %v188_v21 = vadd.f32 %v675_v18, %v187_v20 }
  0xba   :  { %v191_v23 = vmax.f32 %v188_v21, 0.0 }
  0xbc   :  { %v192_v24 = vpack.c.bf16 %v191_v23, %v190_v22 }
  0xbe   :  { %269 = vmatmul.bf16.vlgmr.msra.gmra.mxu1 %v192_v24 }
 0x13b   :  { %v270_v29 = vpop.f32.mrf.mxu1 }
 0x13c   :  { %v271_v31 = vadd.f32 %v676_v28, %v270_v29 }
 0x13e   :  { %v283_v32 = vmul.f32 0.5, %v271_v31 }
 0x140   :  { %v285_v34 = vmul.f32 1.442695, %v283_v32 }
 0x142   :  { %679 = vpow2.f32 %v285_v34 }
 0x143   :  { %v272_v35 = vpop.f32.mrf.mxu1 }
 0x144   :  { %v273_v36 = vadd.f32 %v676_v28, %v272_v35 }
 0x146   :  { %v658_v37 = vpack.c.bf16 %v273_v36, %v271_v31  ;;  %v284_v38 = vmul.f32 0.5, %v273_v36 }
 0x148   :  { %v680_v39 = vpop.eup %679  ;;  %659 = vst [vmem:[%s916_s11] sm:$0xff] %v658_v37   ;;  %v287_v40 = vmul.f32 1.442695, %v284_v38 }
 0x149   :  { %289 = vrot.lane.b32.xlu0 %v680_v39, %s794_s25 }
 0x14a   :  { %681 = vpow2.f32 %v287_v40 }
 0x150   :  { %v682_v41 = vpop.eup %681 }
 0x151   :  { %291 = vrot.lane.b32.xlu0 %v682_v41, %s794_s25 }
 0x1bb   :  { %v290_v50 = vpop.permute.xlu0 %289 }
 0x1bc   :  { %v293_v53 = vmul.f32 %v662_v51, %v290_v50 }
 0x1be   :  { %v295_v56 = vadd.f32 %v293_v53, %v271_v31 }
 0x1c3   :  { %v292_v54 = vpop.permute.xlu0 %291 }
 0x1c4   :  { %v294_v55 = vmul.f32 %v663_v52, %v292_v54 }
 0x1c6   :  { %v296_v57 = vadd.f32 %v294_v55, %v273_v36 }
 0x1c8   :  { %v297_v58 = vpack.c.bf16 %v296_v57, %v295_v56 }
 0x1ca   :  { %374 = vmatmul.bf16.vlgmr.msra.gmra.mxu2 %v297_v58 }
 0x24d   :  { %v375_v63 = vpop.f32.mrf.mxu2 }
 0x24e   :  { %v376_v1 = vadd.f32 %v677_v0, %v375_v63 }
 0x250   :  { %v380_v4 = vmax.f32 %v376_v1, 0.0 }
 0x255   :  { %v377_v2 = vpop.f32.mrf.mxu2 }
 0x256   :  { %v378_v3 = vadd.f32 %v677_v0, %v377_v2 }
 0x258   :  { %v381_v5 = vmax.f32 %v378_v3, 0.0 }
 0x25a   :  { %v382_v6 = vpack.c.bf16 %v381_v5, %v380_v4 }
 0x25c   :  { %459 = vmatmul.bf16.vlgmr.msra.gmra.mxu3 %v382_v6 }
 0x2df   :  { %v460_v8 = vpop.f32.mrf.mxu3 }
 0x2e0   :  { %v461_v9 = vadd.f32 %v678_v7, %v460_v8 }
 0x2e2   :  { %v465_v10 = vsub.f32 0.0, %v461_v9 }
 0x2e4   :  { %v467_v11 = vmul.f32 1.442695, %v465_v10 }
 0x2e6   :  { %683 = vpow2.f32 %v467_v11 }
 0x2e7   :  { %v462_v12 = vpop.f32.mrf.mxu3 }
 0x2e8   :  { %v463_v13 = vadd.f32 %v678_v7, %v462_v12 }
 0x2ea   :  { %v466_v14 = vsub.f32 0.0, %v463_v13 }
 0x2ec   :  { %v469_v15 = vmul.f32 1.442695, %v466_v14  ;;  %v684_v16 = vpop.eup %683 }
 0x2ed   :  { %v471_v17 = vadd.f32 1.0, %v684_v16 }
 0x2ee   :  { %685 = vpow2.f32 %v469_v15 }
 0x2ef   :  { %687 = vrcp.f32 %v471_v17 }
 0x2f4   :  { %v686_v18 = vpop.eup %685 }
 0x2f5   :  { %v472_v19 = vadd.f32 1.0, %v686_v18  ;;  %v688_v20 = vpop.eup %687 }
 0x2f7   :  { %689 = vrcp.f32 %v472_v19 }
 0x2fd   :  { %v690_v21 = vpop.eup %689 }
 0x2fe   :  { %v667_v22 = vpack.c.bf16 %v690_v21, %v688_v20 }
 0x300   :  { %668 = vst [vmem:[%s915_s10] sm:$0xff] %v667_v22  }
 0x301   :  { %487 = vsyncpa [#allocation3], 1 }
 0x302   :  { %488 = vsyncpa [#allocation5], 1 }
 0x303   :  { %489 = vsyncpa [#allocation8], 1 }

</bundles_post_ra>
